<compile_context>
chip_gen: v6e
topology: v6e:2x2x1
jax: 0.10.0
libtpu: 0.0.40
codegen_flags: <defaults>
</compile_context>

<pallas_src>
import functools

import jax
import jax.numpy as jnp
from jax import lax
from jax.experimental import pallas as pl
from jax.experimental.pallas import tpu as pltpu


_vmem_spec = functools.partial(pl.BlockSpec, memory_space=pltpu.MemorySpace.VMEM)

LABEL_PAD = 128  # lane-dense padding for the tag/label dimension


def _round_up(x, m):
    return (x + m - 1) // m * m


# --------------------------------------------------------------------------------------
# Kernel 1: synthetic encoder dense + hidden2tag linear  (the matmul hot path)
# --------------------------------------------------------------------------------------
def _emissions_kernel(emb_ref, w_enc_ref, b_enc_ref, w_tag_ref, b_tag_ref, out_ref):
    # emb: (tm, H) bf16   w_enc: (H, H) bf16   b_enc: (1, H) f32
    # w_tag: (H, Lp) bf16  b_tag: (1, Lp) f32   out: (tm, Lp) f32  (Lp = 128, lane dense)
    h = jnp.tanh(
        jnp.dot(emb_ref[...], w_enc_ref[...], preferred_element_type=jnp.float32)
        + b_enc_ref[...]
    )
    # dropout(p=0.1) is identity in eval mode.
    out_ref[...] = (
        jnp.dot(h.astype(jnp.bfloat16), w_tag_ref[...],
                preferred_element_type=jnp.float32)
        + b_tag_ref[...]
    )


def compute_emissions(emb_flat, w_enc, b_enc, w_tag, b_tag, *, tm=256):
    n_tok, H = emb_flat.shape
    Lp = w_tag.shape[1]
    tm = min(tm, _round_up(n_tok, 8))
    n_pad = _round_up(n_tok, tm)
    if n_pad != n_tok:
        emb_flat = jnp.pad(emb_flat, ((0, n_pad - n_tok), (0, 0)))

    cost = pl.CostEstimate(
        flops=2 * n_pad * H * (H + Lp),
        transcendentals=n_pad * H,
        bytes_accessed=(n_pad * H * emb_flat.dtype.itemsize
                        + H * H * w_enc.dtype.itemsize
                        + H * Lp * w_tag.dtype.itemsize
                        + (H + Lp) * 4
                        + n_pad * Lp * 4),
    )

    out = pl.pallas_call(
        _emissions_kernel,
        out_shape=jax.ShapeDtypeStruct((n_pad, Lp), jnp.float32),
        grid=(n_pad // tm,),
        in_specs=[
            pl.BlockSpec((tm, H), lambda i: (i, 0)),     # token tiles stream through VMEM
            pl.BlockSpec((H, H), lambda i: (0, 0)),      # weights stay VMEM-resident
            pl.BlockSpec((1, H), lambda i: (0, 0)),
            pl.BlockSpec((H, Lp), lambda i: (0, 0)),
            pl.BlockSpec((1, Lp), lambda i: (0, 0)),
        ],
        out_specs=pl.BlockSpec((tm, Lp), lambda i: (i, 0)),
        compiler_params=pltpu.CompilerParams(
            dimension_semantics=("parallel",),          # v7x: shard token grid over 2 TCs
            vmem_limit_bytes=32 * 1024 * 1024,          # fits v5e/v6e/v7x scoped budgets
        ),
        cost_estimate=cost,
    )(emb_flat, w_enc, b_enc, w_tag, b_tag)
    return out[:n_tok]


# --------------------------------------------------------------------------------------
# Kernel 2: CRF negative log-likelihood (torchcrf semantics, reduction='mean')
# --------------------------------------------------------------------------------------
def _crf_nll_kernel(em_ref, lab_ref, mask_ref, start_ref, end_ref,
                    trans_ref, trans_b_ref, loss_ref):
    # em:      (S, L, B) f32   time-major emissions, batch on lanes
    # lab:     (S, 1, B) int32 gold tags (-100 already mapped to 0)
    # mask:    (S, 1, B) f32 in {0,1};  mask[0] == 1 guaranteed by the wrapper
    # start/end: (L, 1) f32;  trans: (L, L) f32;  trans_b: (L, L, 1) f32 (= trans[:,:,None])
    S, L, B = em_ref.shape

    start = start_ref[...]
    end = end_ref[...]
    trans = trans_ref[...]
    trans_b = trans_b_ref[...]

    iota_l = lax.broadcasted_iota(jnp.int32, (L, B), 0)

    def one_hot(t):
        return (lab_ref[t] == iota_l).astype(jnp.float32)             # (L, B)

    oh0 = one_hot(0)
    em0 = em_ref[0]                                                    # (L, B)
    num = jnp.sum((start + em0) * oh0, axis=0, keepdims=True)          # (1, B)
    alpha = start + em0                                                # (L, B)

    def step(t, carry):
        num, alpha, prev_oh, last_oh = carry
        cur_oh = one_hot(t)                                            # (L, B)
        em_t = em_ref[t]                                               # (L, B)
        m_t = mask_ref[t]                                              # (1, B)

        # gold-path score: sum_{i,j} prev[i,b] * trans[i,j] * cur[j,b]
        #                = sum_i prev[i,b] * (trans @ cur)[i,b]   (tiny MXU matmul,
        #                  no (B,L,L) intermediate)
        t_sc = jnp.sum(
            prev_oh * jnp.dot(trans, cur_oh, preferred_element_type=jnp.float32),
            axis=0, keepdims=True)                                     # (1, B)
        e_sc = jnp.sum(em_t * cur_oh, axis=0, keepdims=True)           # (1, B)
        num = num + (t_sc + e_sc) * m_t

        # forward recursion: alpha'[j,b] = logsumexp_i(alpha[i,b] + trans[i,j] + em[t,j,b])
        # leading (prev-tag) axis reduces across vregs on the VPU; batch stays on lanes.
        sc = alpha[:, None, :] + trans_b + em_t[None, :, :]            # (L, L, B)
        mx = jnp.max(sc, axis=0)                                       # (L, B)
        nxt = jnp.log(jnp.sum(jnp.exp(sc - mx[None, :, :]), axis=0)) + mx
        keep = m_t > 0.0                                               # (1, B)
        alpha = jnp.where(keep, nxt, alpha)
        last_oh = jnp.where(keep, cur_oh, last_oh)
        return num, alpha, cur_oh, last_oh

    num, alpha, _, last_oh = lax.fori_loop(
        1, S, step, (num, alpha, oh0, oh0), unroll=4)

    # end transition at the last valid timestep (tracked incrementally; no float ==)
    num = num + jnp.sum(last_oh * end, axis=0, keepdims=True)          # (1, B)

    alpha = alpha + end                                                # (L, B)
    amax = jnp.max(alpha, axis=0, keepdims=True)                       # (1, B)
    logz = jnp.log(jnp.sum(jnp.exp(alpha - amax), axis=0, keepdims=True)) + amax

    llh = num - logz                                                   # (1, B)
    loss_ref[...] = -jnp.sum(llh, axis=1, keepdims=True) / float(B)    # (1, 1)


def crf_nll(emissions, labels, mask, start, end, trans):
    # emissions: (B, S, L) f32;  labels/mask: (B, S)
    B, S, L = emissions.shape
    # wrapper-side layout plumbing: time-major, batch on the lane axis
    em_t = jnp.transpose(emissions, (1, 2, 0)).astype(jnp.float32)     # (S, L, B)
    lab_t = jnp.transpose(labels, (1, 0)).astype(jnp.int32).reshape(S, 1, B)
    mask_t = jnp.transpose(mask, (1, 0)).astype(jnp.float32).reshape(S, 1, B)
    loss = pl.pallas_call(
        _crf_nll_kernel,
        out_shape=jax.ShapeDtypeStruct((1, 1), jnp.float32),
        in_specs=[_vmem_spec()] * 7,
        out_specs=_vmem_spec(),
    )(em_t, lab_t, mask_t,
      start.reshape(L, 1), end.reshape(L, 1), trans, trans.reshape(L, L, 1))
    return loss[0, 0]


# --------------------------------------------------------------------------------------
# Parameters + full forward (glue in plain JAX)
# --------------------------------------------------------------------------------------
def init_params(key, vocab_size, hidden, num_labels, label_pad=LABEL_PAD):
    ks = jax.random.split(key, 6)
    scale = float(hidden) ** -0.5
    w_tag = jax.random.normal(ks[2], (hidden, num_labels), jnp.float32) * scale
    w_tag_pad = jnp.zeros((hidden, label_pad), jnp.float32).at[:, :num_labels].set(w_tag)
    return dict(
        # bf16 matmul inputs (MXU-native); biases and CRF params stay f32.
        embed=(jax.random.normal(ks[0], (vocab_size, hidden), jnp.float32)
               * 0.02).astype(jnp.bfloat16),
        w_enc=(jax.random.normal(ks[1], (hidden, hidden), jnp.float32)
               * scale).astype(jnp.bfloat16),
        b_enc=jnp.zeros((1, hidden), jnp.float32),
        w_tag=w_tag_pad.astype(jnp.bfloat16),
        b_tag=jnp.zeros((1, label_pad), jnp.float32),
        # torchcrf initializes its parameters with uniform(-0.1, 0.1)
        crf_start=jax.random.uniform(ks[3], (num_labels,), jnp.float32, -0.1, 0.1),
        crf_end=jax.random.uniform(ks[4], (num_labels,), jnp.float32, -0.1, 0.1),
        crf_trans=jax.random.uniform(ks[5], (num_labels, num_labels), jnp.float32,
                                     -0.1, 0.1),
    )


def token_classification_forward(params, input_ids, attention_mask=None, labels=None):
    B, S = input_ids.shape
    L = params["crf_trans"].shape[0]

    # synthetic base model: bf16 embedding lookup (XLA gather) + tanh dense encoder.
    emb = jnp.take(params["embed"], input_ids.reshape(-1), axis=0)     # (B*S, H) bf16
    logits_pad = compute_emissions(
        emb, params["w_enc"], params["b_enc"], params["w_tag"], params["b_tag"]
    )                                                                   # (B*S, 128) f32
    emissions = logits_pad[:, :L].reshape(B, S, L)

    if labels is None:
        return {"logits": emissions}

    if attention_mask is None:
        attention_mask = jnp.ones((B, S), jnp.int32)
    elif attention_mask.shape[1] > 0:
        attention_mask = attention_mask.at[:, 0].set(1)

    labels = jnp.where(labels == -100, 0, labels)
    loss = crf_nll(
        emissions, labels, attention_mask,
        params["crf_start"], params["crf_end"], params["crf_trans"],
    )
    return {"loss": loss, "logits": emissions}


# --------------------------------------------------------------------------------------
# Pure-JAX reference for the CRF NLL (validation only)
# --------------------------------------------------------------------------------------
def _crf_nll_ref(emissions, labels, mask, start, end, trans):
    B, S, L = emissions.shape
    em = emissions.astype(jnp.float32)
    mf = mask.astype(jnp.float32)
    tags = labels
    ar = jnp.arange(B)
    num = start[tags[:, 0]] + em[ar, 0, tags[:, 0]]
    alpha = start[None, :] + em[:, 0]
    for i in range(1, S):
        num = num + (trans[tags[:, i - 1], tags[:, i]] + em[ar, i, tags[:, i]]) * mf[:, i]
        nxt = jax.scipy.special.logsumexp(
            alpha[:, :, None] + trans[None, :, :] + em[:, i][:, None, :], axis=1
        )
        alpha = jnp.where(mf[:, i][:, None] > 0, nxt, alpha)
    seq_ends = jnp.sum(mask, axis=1).astype(jnp.int32) - 1
    num = num + end[tags[ar, seq_ends]]
    logz = jax.scipy.special.logsumexp(alpha + end[None, :], axis=1)
    return -jnp.mean(num - logz)


if __name__ == "__main__":
    B, S, H, L, V = 2, 8, 32, 5, 50
    key = jax.random.PRNGKey(0)
    kp, kid, klab = jax.random.split(key, 3)

    params = init_params(kp, V, H, L)
    input_ids = jax.random.randint(kid, (B, S), 0, V, dtype=jnp.int32)
    attention_mask = jnp.array(
        [[1, 1, 1, 1, 1, 1, 1, 1],
         [1, 1, 1, 1, 1, 0, 0, 0]], dtype=jnp.int32)
    labels = jax.random.randint(klab, (B, S), 0, L, dtype=jnp.int32)
    labels = jnp.where(attention_mask == 0, -100, labels)

    out = token_classification_forward(params, input_ids, attention_mask, labels)
    jax.block_until_ready(out)

    # also exercise the no-labels (inference) path
    out_nolab = token_classification_forward(params, input_ids)
    jax.block_until_ready(out_nolab)

    # validate the Pallas CRF loss against a pure-JAX reference (same kernel logits)
    mask_fixed = attention_mask.at[:, 0].set(1)
    labels_fixed = jnp.where(labels == -100, 0, labels)
    ref_loss = _crf_nll_ref(
        out["logits"], labels_fixed, mask_fixed,
        params["crf_start"], params["crf_end"], params["crf_trans"],
    )
    assert out["logits"].shape == (B, S, L)
    assert out_nolab["logits"].shape == (B, S, L)
    assert jnp.allclose(out["loss"], ref_loss, rtol=1e-3, atol=1e-3), (out["loss"], ref_loss)

    print("KERNEL_OK")
</pallas_src>

<mosaic_0001>
module attributes {stable_mosaic.version = 11 : i64} {
  func.func @_emissions_kernel(%arg0: i32, %arg1: memref<16x32xbf16, #tpu.memory_space<vmem>>, %arg2: memref<32x32xbf16, #tpu.memory_space<vmem>>, %arg3: memref<1x32xf32, #tpu.memory_space<vmem>>, %arg4: memref<32x128xbf16, #tpu.memory_space<vmem>>, %arg5: memref<1x128xf32, #tpu.memory_space<vmem>>, %arg6: memref<16x128xf32, #tpu.memory_space<vmem>>) attributes {dimension_semantics = [#tpu.dimension_semantics<parallel>], iteration_bounds = array<i64: 1>, scalar_prefetch = 0 : i64, scratch_operands = 0 : i64, tpu.core_type = #tpu.core_type<tc>, window_params = [{transform_indices = @transform_0, window_bounds = array<i64: 16, 32>}, {pipeline_mode = #tpu.pipeline_mode<synchronous>, transform_indices = @transform_1, window_bounds = array<i64: 32, 32>}, {pipeline_mode = #tpu.pipeline_mode<synchronous>, transform_indices = @transform_2, window_bounds = array<i64: 1, 32>}, {pipeline_mode = #tpu.pipeline_mode<synchronous>, transform_indices = @transform_3, window_bounds = array<i64: 32, 128>}, {pipeline_mode = #tpu.pipeline_mode<synchronous>, transform_indices = @transform_4, window_bounds = array<i64: 1, 128>}, {transform_indices = @transform_5, window_bounds = array<i64: 16, 128>}]} {
    %c0 = arith.constant 0 : index
    %c0_0 = arith.constant 0 : index
    %0 = vector.load %arg1[%c0, %c0_0] : memref<16x32xbf16, #tpu.memory_space<vmem>>, vector<16x32xbf16>
    %c0_1 = arith.constant 0 : index
    %c0_2 = arith.constant 0 : index
    %1 = vector.load %arg2[%c0_1, %c0_2] : memref<32x32xbf16, #tpu.memory_space<vmem>>, vector<32x32xbf16>
    %cst = arith.constant dense<0.000000e+00> : vector<16x32xf32>
    %2 = tpu.matmul %0, %1, %cst {dimension_numbers = #tpu.dot_dimension_numbers<[1], [0], [0], [1], [0, 0, 1, 1], [], []>} : vector<16x32xbf16>, vector<32x32xbf16>, vector<16x32xf32> -> vector<16x32xf32>
    %c0_3 = arith.constant 0 : index
    %c0_4 = arith.constant 0 : index
    %3 = vector.load %arg3[%c0_3, %c0_4] : memref<1x32xf32, #tpu.memory_space<vmem>>, vector<1x32xf32>
    %4 = vector.broadcast %3 : vector<1x32xf32> to vector<16x32xf32>
    %5 = arith.addf %2, %4 : vector<16x32xf32>
    %6 = math.tanh %5 : vector<16x32xf32>
    %7 = arith.truncf %6 : vector<16x32xf32> to vector<16x32xbf16>
    %c0_5 = arith.constant 0 : index
    %c0_6 = arith.constant 0 : index
    %8 = vector.load %arg4[%c0_5, %c0_6] : memref<32x128xbf16, #tpu.memory_space<vmem>>, vector<32x128xbf16>
    %cst_7 = arith.constant dense<0.000000e+00> : vector<16x128xf32>
    %9 = tpu.matmul %7, %8, %cst_7 {dimension_numbers = #tpu.dot_dimension_numbers<[1], [0], [0], [1], [0, 0, 1, 1], [], []>} : vector<16x32xbf16>, vector<32x128xbf16>, vector<16x128xf32> -> vector<16x128xf32>
    %c0_8 = arith.constant 0 : index
    %c0_9 = arith.constant 0 : index
    %10 = vector.load %arg5[%c0_8, %c0_9] : memref<1x128xf32, #tpu.memory_space<vmem>>, vector<1x128xf32>
    %11 = vector.broadcast %10 : vector<1x128xf32> to vector<16x128xf32>
    %12 = arith.addf %9, %11 : vector<16x128xf32>
    %c0_10 = arith.constant 0 : index
    %c0_11 = arith.constant 0 : index
    %13 = vector.load %arg6[%c0_10, %c0_11] : memref<16x128xf32, #tpu.memory_space<vmem>>, vector<16x128xf32>
    tpu.vector_store %arg6[%c0_10, %c0_11], %12 {strides = array<i32>} : memref<16x128xf32, #tpu.memory_space<vmem>>, vector<16x128xf32>,
    return
  }
  func.func @transform_0(%arg0: i32) -> (i32, i32) {
    %c0_i32 = arith.constant 0 : i32
    %c0_i32_0 = arith.constant 0 : i32
    return %arg0, %c0_i32 : i32, i32
  }
  func.func @transform_1(%arg0: i32) -> (i32, i32) {
    %c0_i32 = arith.constant 0 : i32
    %c0_i32_0 = arith.constant 0 : i32
    %c0_i32_1 = arith.constant 0 : i32
    return %c0_i32, %c0_i32_0 : i32, i32
  }
  func.func @transform_2(%arg0: i32) -> (i32, i32) {
    %c0_i32 = arith.constant 0 : i32
    %c0_i32_0 = arith.constant 0 : i32
    %c0_i32_1 = arith.constant 0 : i32
    return %c0_i32, %c0_i32_0 : i32, i32
  }
  func.func @transform_3(%arg0: i32) -> (i32, i32) {
    %c0_i32 = arith.constant 0 : i32
    %c0_i32_0 = arith.constant 0 : i32
    %c0_i32_1 = arith.constant 0 : i32
    return %c0_i32, %c0_i32_0 : i32, i32
  }
  func.func @transform_4(%arg0: i32) -> (i32, i32) {
    %c0_i32 = arith.constant 0 : i32
    %c0_i32_0 = arith.constant 0 : i32
    %c0_i32_1 = arith.constant 0 : i32
    return %c0_i32, %c0_i32_0 : i32, i32
  }
  func.func @transform_5(%arg0: i32) -> (i32, i32) {
    %c0_i32 = arith.constant 0 : i32
    %c0_i32_0 = arith.constant 0 : i32
    return %arg0, %c0_i32 : i32, i32
  }
}

</mosaic_0001>

<bundles_post_ra>
// kernel: tpu_custom_call.1
= control target key start
LH: loop header
LB: loop body
LE: loop exit
PB: predicated region body
PF: predicated region fallthrough
CT: control target
= control target key end

     0   :  { %10 = vsyncpa [#allocation3], 0  ;;  %s424_s0 = inlined_call_operand.hbm [shape: bf16[16,32], index: 0, kind: input, shape index: {}]   ;;  %s425_s1 = inlined_call_operand.hbm [shape: bf16[32,32], index: 1, kind: input, shape index: {}]   ;;  %s426_s2 = inlined_call_operand.vmem [shape: f32[1,32], index: 2, kind: input, shape index: {}]   ;;  %s427_s3 = inlined_call_operand.hbm [shape: bf16[32,128], index: 3, kind: input, shape index: {}]   ;;  %s428_s4 = inlined_call_operand.vmem [shape: f32[1,128], index: 4, kind: input, shape index: {}]   ;;  %s429_s5 = inlined_call_operand.hbm [shape: f32[16,128], index: 5, kind: output, shape index: {}]  }
   0x1   :  { %11 = vsyncpa [#allocation6], 0 }
   0x2   :  { %12 = vsyncpa [#allocation4], 0  ;;  %s364_s18 = smov [#allocation5]   ;;  %s365_s20 = smov [#allocation2]  }
   0x3   :  { %s30_s19 = sshll.u32 %s364_s18, 4  ;;  %s18_s21 = sshll.u32 %s365_s20, 4  ;;  %s31_s19 = int_to_ptr.vmem [resolvable:$true] %s30_s19  ;;  %s19_s21 = int_to_ptr.vmem [resolvable:$true] %s18_s21 }
   0x4   :  { %s286_s22 = scalar_lea.vmem %s31_s19, 256  ;;  %p291_p1 = scmp.lt.s32.totalorder %s31_s19, %s31_s19 }
   0x5   :  { %p287_p0 = scmp.ne.s32.totalorder %s31_s19, %s286_s22  ;;  %p292_p2 = scmp.lt.s32.totalorder %s286_s22, %s286_s22 }
   0x7   :  { %p293_p3 = por %p292_p2, %p291_p1 }
   0x9   :  { %p294_p4 = pnand %p293_p3, %p287_p0 }
   0xb   :  { %297 = shalt.err (!%p294_p4)
}
   0xc   :  { %s366_s23 = smov 64   ;;  %s367_s24 = smov 4  }
   0xd   :  { %36 = dma.hbm_to_vmem [thread:$0]  %s425_s1, 256, %s31_s19, [#allocation6], %s366_s23, %s366_s23, %s367_s24  }
   0xe   :  { %s306_s27 = scalar_lea.vmem %s19_s21, 128  ;;  %p311_p6 = scmp.lt.s32.totalorder %s19_s21, %s19_s21 }
   0xf   :  { %p307_p5 = scmp.ne.s32.totalorder %s19_s21, %s306_s27  ;;  %p312_p7 = scmp.lt.s32.totalorder %s306_s27, %s306_s27 }
  0x11   :  { %p313_p8 = por %p312_p7, %p311_p6 }
  0x13   :  { %p314_p9 = pnand %p313_p8, %p307_p5 }
  0x15   :  { %317 = shalt.err (!%p314_p9)
}
  0x16   :  { %24 = dma.hbm_to_vmem [thread:$0]  %s424_s0, 128, %s19_s21, [#allocation3], %s366_s23, %s366_s23, %s367_s24  }
  0x17   :  { %s368_s30 = smov [#allocation7]  }
  0x18   :  { %s44_s6 = sshll.u32 %s368_s30, 4  ;;  %s45_s6 = int_to_ptr.vmem [resolvable:$true] %s44_s6 }
  0x19   :  { %s326_s7 = scalar_lea.vmem %s45_s6, 256  ;;  %p331_p11 = scmp.lt.s32.totalorder %s45_s6, %s45_s6 }
  0x1a   :  { %p327_p10 = scmp.ne.s32.totalorder %s45_s6, %s326_s7  ;;  %p332_p12 = scmp.lt.s32.totalorder %s326_s7, %s326_s7 }
  0x1c   :  { %p333_p13 = por %p332_p12, %p331_p11 }
  0x1e   :  { %p334_p0 = pnand %p333_p13, %p327_p10 }
  0x20   :  { %337 = shalt.err (!%p334_p0)
}
  0x21   :  { %50 = dma.hbm_to_vmem [thread:$0]  %s427_s3, 256, %s45_s6, [#allocation6], %s366_s23, %s366_s23, %s367_s24  }
  0x22   :  { %358 = dma.done.wait [#allocation3], 128  }
  0x23   :  { %359 = vsyncadd [#allocation3], 4294967168 }
  0x24   :  { %360 = dma.done.wait [#allocation6], 512  }
  0x25   :  { %361 = vsyncadd [#allocation6], 4294966784  ;;  %v369_v0 = vmov 0.0   ;;  %vm370_vm0 = vmmov 0   ;;  %v269_v1 = vld [vmem:[#allocation5 + $0x8] sm:$0xff]   ;;  %v270_v2 = vld [vmem:[#allocation5] sm:$0xff]  }
  0x26   :  { %243 = vmatprep.subr.bf16.mxu0 %v369_v0  ;;  %247 = vmatprep.mubr.msk.bf16.mxu0 %vm370_vm0, %v369_v0  ;;  %v271_v3 = vld [vmem:[#allocation2] sm:$0xff]   ;;  %vm93_vm1 = vcmask 261120   ;;  %v273_v5 = vld [vmem:[#allocation7] sm:$0xff]  }
  0x27   :  { %251 = vmatprep.subr.bf16.mxu1 %v369_v0  ;;  %255 = vmatprep.mubr.msk.bf16.mxu1 %vm370_vm0, %v369_v0  ;;  %v272_v4 = vld [vmem:[#allocation7 + $0x8] sm:$0xff]  }
  0x28   :  { %244 = vmatpush3.bf16.msra.mxu0 %v269_v1  ;;  %252 = vmatpush3.bf16.msra.mxu1 %v272_v4  ;;  %v228_v6 = vld [vmem:[%s426_s2] ss:$0 sm:$0xff]  ;;  %s371_s2 = smov [#allocation8]  }
  0x29   :  { %245 = vmatprep.subr.bf16.mxu0 %v369_v0  ;;  %253 = vmatprep.subr.bf16.mxu1 %v369_v0  ;;  %v233_v16 = vld [vmem:[%s428_s4] ss:$0 sm:$0xff]  ;;  %s215_s11 = sshll.u32 %s371_s2, 4  ;;  %s216_s11 = int_to_ptr.vmem [resolvable:$true] %s215_s11 }
  0x2a   :  { %s338_s12 = scalar_lea.vmem %s216_s11, 256  ;;  %p343_p2 = scmp.lt.s32.totalorder %s216_s11, %s216_s11 }
  0x2b   :  { %p339_p1 = scmp.ne.s32.totalorder %s216_s11, %s338_s12  ;;  %p344_p3 = scmp.lt.s32.totalorder %s338_s12, %s338_s12 }
  0x2c   :  { %246 = vmatpush3.bf16.msra.mxu0 %v270_v2  ;;  %254 = vmatpush3.bf16.msra.mxu1 %v273_v5 }
  0x2d   :  { %p345_p4 = por %p344_p3, %p343_p2 }
  0x2f   :  { %248 = vmatmul.mubr.msk.bf16.vlgmr.msra.gmra.mxu0 %vm93_vm1, %v271_v3  ;;  %p346_p5 = pnand %p345_p4, %p339_p1 }
  0xef   :  { %v131_v7 = vpop.f32.mrf.mxu0 }
  0xf0   :  { %v132_v8 = vadd.f32 %v228_v6, %v131_v7 }
  0xf1   :  { %v249_v9 = vpop.f32.mrf.mxu0 }
  0xf2   :  { %274 = vtanh.f32 %v132_v8 }
  0xf3   :  { %v134_v10 = vpop.f32.mrf.mxu0 }
  0xf4   :  { %v135_v11 = vadd.f32 %v228_v6, %v134_v10 }
  0xf5   :  { %v250_v12 = vpop.f32.mrf.mxu0 }
  0xf6   :  { %276 = vtanh.f32 %v135_v11 }
  0xff   :  { %v275_v13 = vpop.eup %274 }
 0x103   :  { %v277_v14 = vpop.eup %276 }
 0x104   :  { %v140_v15 = vpack.c.bf16 %v277_v14, %v275_v13 }
 0x106   :  { %256 = vmatmul.mubr.msk.bf16.vlgmr.msra.gmra.mxu1 %vm93_vm1, %v140_v15 }
 0x1c6   :  { %v201_v17 = vpop.f32.mrf.mxu1 }
 0x1c7   :  { %v202_v18 = vadd.f32 %v233_v16, %v201_v17 }
 0x1c8   :  { %v257_v19 = vpop.f32.mrf.mxu1 }
 0x1c9   :  { %208 = vst [vmem:[#allocation8] sm:$0xff] %v202_v18 }
 0x1ca   :  { %v204_v20 = vpop.f32.mrf.mxu1 }
 0x1cb   :  { %v205_v21 = vadd.f32 %v233_v16, %v204_v20 }
 0x1cc   :  { %v258_v22 = vpop.f32.mrf.mxu1 }
 0x1cd   :  { %209 = vst [vmem:[#allocation8 + $0x8] sm:$0xff] %v205_v21 }
 0x1ce   :  { %349 = shalt.err (!%p346_p5)
}
 0x1cf   :  { %s372_s13 = smov 128   ;;  %s373_s4 = smov 8  }
 0x1d0   :  { %221 = dma.vmem_to_hbm [thread:$0]  %s216_s11, 256, %s429_s5, [#allocation4], %s372_s13, %s372_s13, %s373_s4  }
 0x1d1   :  { %362 = dma.done.wait [#allocation4], 256  }
 0x1d2   :  { %363 = vsyncadd [#allocation4], 4294967040 }
 0x1d3   :  { %225 = vsyncpa [#allocation3], 1 }
 0x1d4   :  { %226 = vsyncpa [#allocation6], 1 }
 0x1d5   :  { %227 = vsyncpa [#allocation4], 1 }

</bundles_post_ra>
